<compile_context>
chip_gen: v6e
topology: v6e:2x2x1
jax: 0.10.0
libtpu: 0.0.40
codegen_flags: <defaults>
</compile_context>

<pallas_src>
import functools

import jax
import jax.numpy as jnp
from jax import lax
from jax.experimental import pallas as pl
from jax.experimental.pallas import tpu as pltpu

_V_HALF = 1      # v_size = 3 vertical box filter in generate_mask_v0
_POOL_HALF = 3   # k_size = 7 max-pool dilation in generate_mask_v0


def _soft_norm_kernel(x_ref, conv_ref, row_ref, feat_ref, attn_ref, *,
                      p, eps, bn_scale, bn_shift):
    x = x_ref[...].astype(jnp.float32)                        # (Bt, C, HW)

    # ---- channel "p-norm": clamp(min=eps) ** p -> sum over C -> ** (1/p) ----
    xc = jnp.maximum(x, eps)
    p_int = int(p)
    if float(p_int) == float(p) and 1 <= p_int <= 8:
        powed = xc
        for _ in range(p_int - 1):                            # cheap VPU multiplies
            powed = powed * xc
    else:
        powed = jnp.exp(jnp.log(xc) * p)                      # EUP (xc >= eps > 0)
    s = jnp.sum(powed, axis=1)                                # (Bt, HW)
    norm = jnp.exp(jnp.log(s) * (1.0 / p))                    # (Bt, HW)

    # ---- generate_mask_v0, eval path ----
    # sum over w + 3-tap vertical conv folded into one (HW x H) 0/1 matmul (MXU).
    y = jnp.dot(norm, conv_ref[...], preferred_element_type=jnp.float32)  # (Bt, H)
    # vectorized first-occurrence argmax over H
    best = jnp.max(y, axis=-1, keepdims=True)                 # (Bt, 1)
    h_iota = lax.broadcasted_iota(jnp.int32, y.shape, 1).astype(jnp.float32)
    sentinel = jnp.float32(y.shape[-1])
    idx = jnp.min(jnp.where(y == best, h_iota, sentinel),
                  axis=-1, keepdims=True)                     # (Bt, 1)
    # max_pool2d(kernel=(7,1), stride 1, pad 3) on the one-hot == |row - idx| <= 3
    rows = row_ref[...]                                       # (1, HW) f32 row-of-pixel
    mask = (jnp.abs(rows - idx) <= float(_POOL_HALF)).astype(jnp.float32)  # (Bt, HW)

    # ---- BatchNorm2d(1) (eval, folded scale/shift) -> sigmoid -> stripe mask ----
    attn = jax.nn.sigmoid(norm * bn_scale + bn_shift) * mask  # (Bt, HW)

    # ---- l2_normalize(x, dim=C) * attn, fused as one per-pixel scale ----
    inv_l2 = lax.rsqrt(jnp.sum(x * x, axis=1))                # (Bt, HW), EUP rsqrt
    scale = attn * inv_l2
    feat_ref[...] = (x * scale[:, None, :]).astype(feat_ref.dtype)
    attn_ref[...] = attn[:, None, :].astype(attn_ref.dtype)


def _choose_batch_tile(b, c, hw, itemsize=4, vmem_budget=24 * 1024 * 1024):
    # double-buffered (input + feature output) tiles must stay inside budget,
    # sized so it also fits v7x's 64 MiB VMEM / 32 MiB scoped default.
    per_elem = 2 * 2 * c * hw * itemsize
    bt = max(1, min(b, vmem_budget // max(per_elem, 1)))
    while b % bt:
        bt -= 1
    return bt


def soft_norm_branch(x, *, p=3.0, eps=1e-6, bn_gamma=1.0, bn_beta=0.0,
                     bn_mean=0.0, bn_var=1.0, bn_eps=1e-5, batch_tile=None):
    """One LocalBranch branch (eval): returns (l2_normalize(x) * attn, attn)."""
    b, c, h, w = x.shape
    hw = h * w
    x3 = x.reshape(b, c, hw)                                  # lane-dense layout

    # folded eval-mode BatchNorm2d(1): init weight=1, bias=0, running stats 0/1
    bn_scale = float(bn_gamma) / float((bn_var + bn_eps) ** 0.5)
    bn_shift = float(bn_beta) - float(bn_mean) * bn_scale

    # constants (built once, resident across grid steps):
    row_of_pixel = jnp.arange(hw, dtype=jnp.int32) // w                   # (HW,)
    h_ids = jnp.arange(h, dtype=jnp.int32)
    conv_mat = (jnp.abs(row_of_pixel[:, None] - h_ids[None, :]) <= _V_HALF
                ).astype(jnp.float32)                                     # (HW, H)
    row_idx = row_of_pixel.astype(jnp.float32)[None, :]                   # (1, HW)

    bt = batch_tile if batch_tile is not None else _choose_batch_tile(b, c, hw)
    assert b % bt == 0, "batch tile must divide batch"

    kernel = functools.partial(_soft_norm_kernel, p=float(p), eps=float(eps),
                               bn_scale=bn_scale, bn_shift=bn_shift)
    feat, attn = pl.pallas_call(
        kernel,
        out_shape=(jax.ShapeDtypeStruct((b, c, hw), jnp.float32),
                   jax.ShapeDtypeStruct((b, 1, hw), jnp.float32)),
        grid_spec=pltpu.PrefetchScalarGridSpec(
            num_scalar_prefetch=0,
            grid=(b // bt,),
            in_specs=[
                pl.BlockSpec((bt, c, hw), lambda i: (i, 0, 0)),
                pl.BlockSpec((hw, h), lambda i: (0, 0)),      # resident constant
                pl.BlockSpec((1, hw), lambda i: (0, 0)),      # resident constant
            ],
            out_specs=[
                pl.BlockSpec((bt, c, hw), lambda i: (i, 0, 0)),
                pl.BlockSpec((bt, 1, hw), lambda i: (i, 0, 0)),
            ],
        ),
        compiler_params=pltpu.CompilerParams(
            dimension_semantics=("parallel",)),
    )(x3, conv_mat, row_idx)
    return feat.reshape(b, c, h, w), attn.reshape(b, 1, h, w)


def local_branch_forward(x, *, num_branch=2, tau=10.0, **soft_norm_kwargs):
    """LocalBranch.forward (eval). Returns (features list, attn list).

    TODO(synk): the per-branch `deepcopy(module)` backbone passed to
    LocalBranch.__init__ is an arbitrary user module with no Pallas
    equivalent here; branches are treated as identity, so SoftNorm is applied
    to x directly. `tau` only affects the training-time gumbel_softmax path
    (not implemented; eval argmax path is used), and BatchNorm uses eval
    running statistics.
    """
    del tau
    feats, attns = [], []
    for _ in range(num_branch):
        f, a = soft_norm_branch(x, **soft_norm_kwargs)
        feats.append(f)
        attns.append(a)
    return feats, attns


if __name__ == "__main__":
    key = jax.random.PRNGKey(0)
    b, c, h, w = 2, 4, 16, 8          # h*w = 128: one full lane width
    num_branch, tau = 2, 10.0
    x = jax.random.normal(key, (b, c, h, w), dtype=jnp.float32)

    feats, attns = local_branch_forward(x, num_branch=num_branch, tau=tau)
    for arr in feats + attns:
        arr.block_until_ready()

    # ---- pure-JAX reference (SoftNorm eval forward + l2_normalize * attn) ----
    p, eps, bn_eps = 3.0, 1e-6, 1e-5
    xc = jnp.maximum(x, eps)
    norm = jnp.sum(xc ** p, axis=1, keepdims=True) ** (1.0 / p)       # (b,1,h,w)
    r = jnp.sum(norm, axis=-1)[:, 0, :]                               # (b,h): sum over w
    rp = jnp.pad(r, ((0, 0), (1, 1)))
    yref = rp[:, :-2] + rp[:, 1:-1] + rp[:, 2:]                       # 3-tap conv, pad=1
    idx = jnp.argmax(yref, axis=1)                                    # (b,)
    hgrid = jnp.arange(h)
    mask_h = (jnp.abs(hgrid[None, :] - idx[:, None]) <= _POOL_HALF).astype(jnp.float32)
    mask = mask_h[:, None, :, None]                                   # (b,1,h,1)
    attn_ref = jax.nn.sigmoid(norm / jnp.sqrt(1.0 + bn_eps)) * mask   # (b,1,h,w)
    feat_ref = x / jnp.sqrt(jnp.sum(x * x, axis=1, keepdims=True)) * attn_ref

    for f, a in zip(feats, attns):
        assert f.shape == (b, c, h, w) and a.shape == (b, 1, h, w)
        assert jnp.allclose(a, attn_ref, atol=1e-5, rtol=1e-4), "attn mismatch"
        assert jnp.allclose(f, feat_ref, atol=1e-5, rtol=1e-4), "feature mismatch"
    print("KERNEL_OK")
</pallas_src>

<mosaic_0001>
module attributes {stable_mosaic.version = 11 : i64} {
  func.func @_soft_norm_kernel(%arg0: i32, %arg1: memref<2x4x128xf32, #tpu.memory_space<vmem>>, %arg2: memref<128x16xf32, #tpu.memory_space<vmem>>, %arg3: memref<1x128xf32, #tpu.memory_space<vmem>>, %arg4: memref<2x4x128xf32, #tpu.memory_space<vmem>>, %arg5: memref<2x1x128xf32, #tpu.memory_space<vmem>>) attributes {dimension_semantics = [#tpu.dimension_semantics<parallel>], iteration_bounds = array<i64: 1>, scalar_prefetch = 0 : i64, scratch_operands = 0 : i64, tpu.core_type = #tpu.core_type<tc>, window_params = [{transform_indices = @transform_0, window_bounds = array<i64: 2, 4, 128>}, {pipeline_mode = #tpu.pipeline_mode<synchronous>, transform_indices = @transform_1, window_bounds = array<i64: 128, 16>}, {pipeline_mode = #tpu.pipeline_mode<synchronous>, transform_indices = @transform_2, window_bounds = array<i64: 1, 128>}, {transform_indices = @transform_3, window_bounds = array<i64: 2, 4, 128>}, {transform_indices = @transform_4, window_bounds = array<i64: 2, 1, 128>}]} {
    %c0 = arith.constant 0 : index
    %c0_0 = arith.constant 0 : index
    %c0_1 = arith.constant 0 : index
    %0 = vector.load %arg1[%c0, %c0_0, %c0_1] : memref<2x4x128xf32, #tpu.memory_space<vmem>>, vector<2x4x128xf32>
    %cst = arith.constant 9.99999997E-7 : f32
    %1 = vector.broadcast %cst : f32 to vector<2x4x128xf32>
    %2 = arith.maximumf %0, %1 : vector<2x4x128xf32>
    %3 = arith.mulf %2, %2 : vector<2x4x128xf32>
    %4 = arith.mulf %3, %2 : vector<2x4x128xf32>
    %cst_2 = arith.constant dense<0.000000e+00> : vector<2x128xf32>
    %5 = vector.multi_reduction <add>, %4, %cst_2 [1] : vector<2x4x128xf32> to vector<2x128xf32>
    %6 = math.log %5 : vector<2x128xf32>
    %cst_3 = arith.constant 0.333333343 : f32
    %7 = vector.broadcast %cst_3 : f32 to vector<2x128xf32>
    %8 = arith.mulf %6, %7 : vector<2x128xf32>
    %9 = math.exp %8 : vector<2x128xf32>
    %c0_4 = arith.constant 0 : index
    %c0_5 = arith.constant 0 : index
    %10 = vector.load %arg2[%c0_4, %c0_5] : memref<128x16xf32, #tpu.memory_space<vmem>>, vector<128x16xf32>
    %cst_6 = arith.constant dense<0.000000e+00> : vector<2x16xf32>
    %11 = tpu.matmul %9, %10, %cst_6 {dimension_numbers = #tpu.dot_dimension_numbers<[1], [0], [0], [1], [0, 0, 1, 1], [], []>} : vector<2x128xf32>, vector<128x16xf32>, vector<2x16xf32> -> vector<2x16xf32>
    %cst_7 = arith.constant dense<0xFF800000> : vector<2xf32>
    %12 = vector.multi_reduction <maximumf>, %11, %cst_7 [1] : vector<2x16xf32> to vector<2xf32>
    %13 = vector.shape_cast %12 : vector<2xf32> to vector<2x1xf32>
    %14 = tpu.iota {dimensions = array<i32: 1>} : vector<2x16xi32>
    %15 = arith.sitofp %14 : vector<2x16xi32> to vector<2x16xf32>
    %16 = vector.broadcast %13 : vector<2x1xf32> to vector<2x16xf32>
    %17 = arith.cmpf oeq, %11, %16 : vector<2x16xf32>
    %cst_8 = arith.constant 1.600000e+01 : f32
    %18 = vector.broadcast %cst_8 : f32 to vector<2x16xf32>
    %19 = arith.select %17, %15, %18 : vector<2x16xi1>, vector<2x16xf32>
    %cst_9 = arith.constant dense<0x7F800000> : vector<2xf32>
    %20 = vector.multi_reduction <minimumf>, %19, %cst_9 [1] : vector<2x16xf32> to vector<2xf32>
    %21 = vector.shape_cast %20 : vector<2xf32> to vector<2x1xf32>
    %c0_10 = arith.constant 0 : index
    %c0_11 = arith.constant 0 : index
    %22 = vector.load %arg3[%c0_10, %c0_11] : memref<1x128xf32, #tpu.memory_space<vmem>>, vector<1x128xf32>
    %23 = vector.broadcast %22 : vector<1x128xf32> to vector<2x128xf32>
    %24 = vector.broadcast %21 : vector<2x1xf32> to vector<2x128xf32>
    %25 = arith.subf %23, %24 : vector<2x128xf32>
    %26 = math.absf %25 : vector<2x128xf32>
    %cst_12 = arith.constant 3.000000e+00 : f32
    %27 = vector.broadcast %cst_12 : f32 to vector<2x128xf32>
    %28 = arith.cmpf ole, %26, %27 : vector<2x128xf32>
    %29 = arith.extui %28 : vector<2x128xi1> to vector<2x128xi32>
    %30 = arith.sitofp %29 : vector<2x128xi32> to vector<2x128xf32>
    %cst_13 = arith.constant 0.999994993 : f32
    %31 = vector.broadcast %cst_13 : f32 to vector<2x128xf32>
    %32 = arith.mulf %9, %31 : vector<2x128xf32>
    %cst_14 = arith.constant 0.000000e+00 : f32
    %33 = vector.broadcast %cst_14 : f32 to vector<2x128xf32>
    %34 = arith.addf %32, %33 : vector<2x128xf32>
    %35 = arith.negf %34 : vector<2x128xf32>
    %36 = math.exp %35 : vector<2x128xf32>
    %cst_15 = arith.constant 1.000000e+00 : f32
    %37 = vector.broadcast %cst_15 : f32 to vector<2x128xf32>
    %38 = arith.addf %37, %36 : vector<2x128xf32>
    %39 = arith.divf %37, %38 : vector<2x128xf32>
    %40 = arith.mulf %39, %30 : vector<2x128xf32>
    %41 = arith.mulf %0, %0 : vector<2x4x128xf32>
    %cst_16 = arith.constant dense<0.000000e+00> : vector<2x128xf32>
    %42 = vector.multi_reduction <add>, %41, %cst_16 [1] : vector<2x4x128xf32> to vector<2x128xf32>
    %43 = math.rsqrt %42 : vector<2x128xf32>
    %44 = arith.mulf %40, %43 : vector<2x128xf32>
    %45 = vector.shape_cast %44 : vector<2x128xf32> to vector<2x1x128xf32>
    %46 = vector.broadcast %45 : vector<2x1x128xf32> to vector<2x4x128xf32>
    %47 = arith.mulf %0, %46 : vector<2x4x128xf32>
    %c0_17 = arith.constant 0 : index
    %c0_18 = arith.constant 0 : index
    %c0_19 = arith.constant 0 : index
    %48 = vector.load %arg4[%c0_17, %c0_18, %c0_19] : memref<2x4x128xf32, #tpu.memory_space<vmem>>, vector<2x4x128xf32>
    tpu.vector_store %arg4[%c0_17, %c0_18, %c0_19], %47 {strides = array<i32>} : memref<2x4x128xf32, #tpu.memory_space<vmem>>, vector<2x4x128xf32>,
    %49 = vector.shape_cast %40 : vector<2x128xf32> to vector<2x1x128xf32>
    %c0_20 = arith.constant 0 : index
    %c0_21 = arith.constant 0 : index
    %c0_22 = arith.constant 0 : index
    %50 = vector.load %arg5[%c0_20, %c0_21, %c0_22] : memref<2x1x128xf32, #tpu.memory_space<vmem>>, vector<2x1x128xf32>
    tpu.vector_store %arg5[%c0_20, %c0_21, %c0_22], %49 {strides = array<i32>} : memref<2x1x128xf32, #tpu.memory_space<vmem>>, vector<2x1x128xf32>,
    return
  }
  func.func @transform_0(%arg0: i32) -> (i32, i32, i32) {
    %c0_i32 = arith.constant 0 : i32
    %c0_i32_0 = arith.constant 0 : i32
    %c0_i32_1 = arith.constant 0 : i32
    return %arg0, %c0_i32, %c0_i32_0 : i32, i32, i32
  }
  func.func @transform_1(%arg0: i32) -> (i32, i32) {
    %c0_i32 = arith.constant 0 : i32
    %c0_i32_0 = arith.constant 0 : i32
    %c0_i32_1 = arith.constant 0 : i32
    return %c0_i32, %c0_i32_0 : i32, i32
  }
  func.func @transform_2(%arg0: i32) -> (i32, i32) {
    %c0_i32 = arith.constant 0 : i32
    %c0_i32_0 = arith.constant 0 : i32
    %c0_i32_1 = arith.constant 0 : i32
    return %c0_i32, %c0_i32_0 : i32, i32
  }
  func.func @transform_3(%arg0: i32) -> (i32, i32, i32) {
    %c0_i32 = arith.constant 0 : i32
    %c0_i32_0 = arith.constant 0 : i32
    %c0_i32_1 = arith.constant 0 : i32
    return %arg0, %c0_i32, %c0_i32_0 : i32, i32, i32
  }
  func.func @transform_4(%arg0: i32) -> (i32, i32, i32) {
    %c0_i32 = arith.constant 0 : i32
    %c0_i32_0 = arith.constant 0 : i32
    %c0_i32_1 = arith.constant 0 : i32
    return %arg0, %c0_i32, %c0_i32_0 : i32, i32, i32
  }
}

</mosaic_0001>

<bundles_post_ra>
// kernel: tpu_custom_call.1
= control target key start
LH: loop header
LB: loop body
LE: loop exit
PB: predicated region body
PF: predicated region fallthrough
CT: control target
= control target key end

     0   :  { %10 = vsyncpa [#allocation3], 0  ;;  %v382_v1 = vmov 0.0   ;;  %vm383_vm0 = vmmov 0   ;;  %s512_s0 = inlined_call_operand.vmem [shape: f32[2,4,128], index: 0, kind: input, shape index: {}]   ;;  %s513_s1 = inlined_call_operand.vmem [shape: f32[128,16], index: 1, kind: input, shape index: {}]   ;;  %s514_s2 = inlined_call_operand.vmem [shape: f32[1,128], index: 2, kind: input, shape index: {}]   ;;  %s515_s3 = inlined_call_operand.hbm [shape: f32[2,4,128], index: 3, kind: output, shape index: {0}]   ;;  %s516_s4 = inlined_call_operand.hbm [shape: f32[2,1,128], index: 4, kind: output, shape index: {1}]  }
   0x1   :  { %v66_v0 = vld [vmem:[%s513_s1 + $0x78] sm:$0xff]  ;;  %275 = vmatprep.subr.mxu0 %v382_v1  ;;  %v65_v2 = vld [vmem:[%s513_s1 + $0x70] sm:$0xff]  ;;  %307 = vmatprep.mubr.msk.f32.mxu0 %vm383_vm0, %v382_v1  ;;  %v64_v3 = vld [vmem:[%s513_s1 + $0x68] sm:$0xff] }
   0x2   :  { %276 = vmatpush3.msra.mxu0 %v66_v0  ;;  %v63_v4 = vld [vmem:[%s513_s1 + $0x60] sm:$0xff] }
   0x3   :  { %277 = vmatprep.subr.mxu0 %v382_v1  ;;  %v434_v5 = vld [vmem:[%s512_s0] sm:$0xf]  ;;  %v439_v6 = vld [vmem:[%s512_s0 + $0x4] sm:$0xf] }
   0x4   :  { %278 = vmatpush3.msra.mxu0 %v65_v2  ;;  %v20_v7 = vmax.f32 %v434_v5, 1e-06  ;;  %v21_v8 = vmax.f32 %v439_v6, 1e-06 }
   0x5   :  { %279 = vmatprep.subr.mxu0 %v382_v1 }
   0x6   :  { %280 = vmatpush3.msra.mxu0 %v64_v3 }
   0x7   :  { %11 = vsyncpa [#allocation5], 0  ;;  %281 = vmatprep.subr.mxu0 %v382_v1  ;;  %v62_v9 = vld [vmem:[%s513_s1 + $0x58] sm:$0xff]  ;;  %v22_v10 = vmul.f32 %v20_v7, %v20_v7  ;;  %v23_v11 = vmul.f32 %v21_v8, %v21_v8  ;;  %v61_v12 = vld [vmem:[%s513_s1 + $0x50] sm:$0xff]  ;;  %vm26_vm1 = vcmask 1043456   ;;  %vm69_vm2 = vcmask 1041409  }
   0x8   :  { %282 = vmatpush3.msra.mxu0 %v63_v4  ;;  %v60_v15 = vld [vmem:[%s513_s1 + $0x48] sm:$0xff]  ;;  %v59_v18 = vld [vmem:[%s513_s1 + $0x40] sm:$0xff]  ;;  %v58_v21 = vld [vmem:[%s513_s1 + $0x38] sm:$0xff]  ;;  %vm142_vm3 = vcmask 123904   ;;  %v146_v53 = vlaneseq  ;;  %v188_v59 = vmul.f32 %v434_v5, %v434_v5  ;;  %v189_v61 = vmul.f32 %v439_v6, %v439_v6  ;;  %s384_s25 = smov [#allocation4]  }
   0x9   :  { %283 = vmatprep.subr.mxu0 %v382_v1  ;;  %v24_v13 = vmul.f32 %v22_v10, %v20_v7  ;;  %v25_v14 = vmul.f32 %v23_v11, %v21_v8  ;;  %v57_v24 = vld [vmem:[%s513_s1 + $0x30] sm:$0xff]  ;;  %v56_v27 = vld [vmem:[%s513_s1 + $0x28] sm:$0xff]  ;;  %v55_v30 = vld [vmem:[%s513_s1 + $0x20] sm:$0xff]  ;;  %s239_s26 = sshll.u32 %s384_s25, 4  ;;  %s240_s26 = int_to_ptr.vmem [resolvable:$true] %s239_s26 }
   0xa   :  { %284 = vmatpush3.msra.mxu0 %v62_v9  ;;  %v54_v33 = vld [vmem:[%s513_s1 + $0x18] sm:$0xff]  ;;  %v53_v36 = vld [vmem:[%s513_s1 + $0x10] sm:$0xff]  ;;  %v52_v37 = vld [vmem:[%s513_s1 + $0x8] sm:$0xff]  ;;  %v147_v54 = vand.u32 127, %v146_v53  ;;  %v190_v63 = vsel %vm26_vm1, %v188_v59, 0.0  ;;  %v197_v3 = vsel %vm26_vm1, %v189_v61, 0.0  ;;  %p343_p1 = scmp.lt.s32.totalorder %s240_s26, %s240_s26 }
   0xb   :  { %285 = vmatprep.subr.mxu0 %v382_v1  ;;  %v27_v16 = vsel %vm26_vm1, %v24_v13, 0.0  ;;  %v34_v17 = vsel %vm26_vm1, %v25_v14, 0.0  ;;  %v51_v38 = vld [vmem:[%s513_s1] sm:$0xff]  ;;  %v191_v2 = vrot.slane %v190_v63, 4  ;;  %v198_v7 = vrot.slane %v197_v3, 4  ;;  %s338_s28 = scalar_lea.vmem %s240_s26, 32 }
   0xc   :  { %286 = vmatpush3.msra.mxu0 %v61_v12  ;;  %v28_v19 = vrot.slane %v27_v16, 4  ;;  %v35_v20 = vrot.slane %v34_v17, 4  ;;  %v148_v55 = vcvt.s32.f32 %v147_v54  ;;  %p339_p0 = scmp.ne.s32.totalorder %s240_s26, %s338_s28  ;;  %p344_p2 = scmp.lt.s32.totalorder %s338_s28, %s338_s28 }
   0xd   :  { %287 = vmatprep.subr.mxu0 %v382_v1  ;;  %v192_v8 = vadd.f32 %v191_v2, %v190_v63  ;;  %v199_v9 = vadd.f32 %v198_v7, %v197_v3 }
   0xe   :  { %288 = vmatpush3.msra.mxu0 %v60_v15  ;;  %v29_v22 = vadd.f32 %v28_v19, %v27_v16  ;;  %v36_v23 = vadd.f32 %v35_v20, %v34_v17  ;;  %p345_p3 = por %p344_p2, %p343_p1 }
   0xf   :  { %289 = vmatprep.subr.mxu0 %v382_v1  ;;  %v193_v10 = vrot.slane %v192_v8, 2  ;;  %v200_v11 = vrot.slane %v199_v9, 2 }
  0x10   :  { %290 = vmatpush3.msra.mxu0 %v59_v18  ;;  %v30_v25 = vrot.slane %v29_v22, 2  ;;  %v37_v26 = vrot.slane %v36_v23, 2  ;;  %p346_p4 = pnand %p345_p3, %p339_p0 }
  0x11   :  { %291 = vmatprep.subr.mxu0 %v382_v1  ;;  %v194_v12 = vadd.f32 %v193_v10, %v192_v8  ;;  %v201_v13 = vadd.f32 %v200_v11, %v199_v9 }
  0x12   :  { %292 = vmatpush3.msra.mxu0 %v58_v21  ;;  %v31_v28 = vadd.f32 %v30_v25, %v29_v22  ;;  %v38_v29 = vadd.f32 %v37_v26, %v36_v23  ;;  %v254_v22 = vld [vmem:[%s514_s2] ss:$0 sm:$0xff]  ;;  %v209_v25 = vshrl.u32 %v146_v53, 7  ;;  %s385_s2 = smov [#allocation2]  }
  0x13   :  { %293 = vmatprep.subr.mxu0 %v382_v1  ;;  %v195_v15 = vrot.slane %v194_v12, 1  ;;  %v202_v18 = vrot.slane %v201_v13, 1  ;;  %s227_s27 = sshll.u32 %s385_s2, 4  ;;  %s228_s27 = int_to_ptr.vmem [resolvable:$true] %s227_s27 }
  0x14   :  { %294 = vmatpush3.msra.mxu0 %v57_v24  ;;  %v32_v31 = vrot.slane %v31_v28, 1  ;;  %v39_v32 = vrot.slane %v38_v29, 1 }
  0x15   :  { %295 = vmatprep.subr.mxu0 %v382_v1  ;;  %v196_v19 = vadd.f32 %v195_v15, %v194_v12  ;;  %v203_v21 = vadd.f32 %v202_v18, %v201_v13 }
  0x16   :  { %296 = vmatpush3.msra.mxu0 %v56_v27  ;;  %v33_v34 = vadd.f32 %v32_v31, %v31_v28  ;;  %v40_v35 = vadd.f32 %v39_v32, %v38_v29  ;;  %v210_v31 = vsub.s32 0, %v209_v25 }
  0x17   :  { %297 = vmatprep.subr.mxu0 %v382_v1 }
  0x18   :  { %298 = vmatpush3.msra.mxu0 %v55_v30  ;;  %318 = vlog2.f32 %v33_v34 }
  0x19   :  { %299 = vmatprep.subr.mxu0 %v382_v1  ;;  %320 = vlog2.f32 %v40_v35 }
  0x1a   :  { %300 = vmatpush3.msra.mxu0 %v54_v33 }
  0x1b   :  { %301 = vmatprep.subr.mxu0 %v382_v1 }
  0x1c   :  { %302 = vmatpush3.msra.mxu0 %v53_v36 }
  0x1d   :  { %303 = vmatprep.subr.mxu0 %v382_v1 }
  0x1e   :  { %304 = vmatpush3.msra.mxu0 %v52_v37 }
  0x1f   :  { %305 = vmatprep.subr.mxu0 %v382_v1 }
  0x20   :  { %306 = vmatpush3.msra.mxu0 %v51_v38 }
  0x25   :  { %v319_v39 = vpop.eup %318 }
  0x26   :  { %v321_v40 = vpop.eup %320  ;;  %v42_v41 = vmul.f32 0.6931472, %v319_v39 }
  0x27   :  { %v44_v42 = vmul.f32 0.6931472, %v321_v40 }
  0x28   :  { %v45_v43 = vmul.f32 0.33333334, %v42_v41 }
  0x29   :  { %v46_v44 = vmul.f32 0.33333334, %v44_v42 }
  0x2a   :  { %v47_v45 = vmul.f32 1.442695, %v45_v43 }
  0x2b   :  { %v49_v46 = vmul.f32 1.442695, %v46_v44 }
  0x2c   :  { %322 = vpow2.f32 %v47_v45 }
  0x2d   :  { %324 = vpow2.f32 %v49_v46 }
  0x39   :  { %v323_v47 = vpop.eup %322 }
  0x3a   :  { %v325_v48 = vpop.eup %324  ;;  %v256_v60 = vmul.f32 -0.999995, %v323_v47 }
  0x3b   :  { %v70_v49 = vsel %vm69_vm2, %v325_v48, %v323_v47  ;;  %v257_v62 = vmul.f32 -0.999995, %v325_v48 }
  0x3c   :  { %308 = vmatmul.mubr.f32.vlgmr.msra.gmra.mxu0 %v70_v49  ;;  %v172_v0 = vmul.f32 1.442695, %v256_v60 }
  0x3d   :  { %v174_v4 = vmul.f32 1.442695, %v257_v62 }
  0x3e   :  { %326 = vpow2.f32 %v172_v0 }
  0x3f   :  { %328 = vpow2.f32 %v174_v4 }
  0x4b   :  { %v327_v14 = vpop.eup %326 }
  0x4c   :  { %v329_v16 = vpop.eup %328  ;;  %v176_v17 = vadd.f32 1.0, %v327_v14 }
  0x4d   :  { %v177_v20 = vadd.f32 1.0, %v329_v16 }
  0x4e   :  { %330 = vrcp.f32 %v176_v17 }
  0x4f   :  { %332 = vrsqrt.f32 %v196_v19 }
  0x50   :  { %334 = vrcp.f32 %v177_v20 }
  0x51   :  { %336 = vrsqrt.f32 %v203_v21 }
  0x5b   :  { %v331_v27 = vpop.eup %330 }
  0x5c   :  { %v333_v28 = vpop.eup %332 }
  0x5d   :  { %v335_v29 = vpop.eup %334 }
  0x5e   :  { %v337_v34 = vpop.eup %336 }
  0xfc   :  { %v138_v50 = vpop.f32.mrf.mxu0 }
  0xfd   :  { %v143_v51 = vsel %vm142_vm3, %v138_v50, -inf }
  0xfe   :  { %144 = vmax.xlane.f32.xlu0 %v143_v51  ;;  %v309_v52 = vpop.f32.mrf.mxu0 }
 0x187   :  { %v145_v56 = vpop.xlane.xlu0 %144 }
 0x188   :  { %vm149_vm4 = vcmp.eq.f32.partialorder %v138_v50, %v145_v56 }
 0x189   :  { %v150_v57 = vsel %vm149_vm4, %v148_v55, 16.0 }
 0x18a   :  { %v151_v58 = vsel %vm142_vm3, %v150_v57, inf }
 0x18b   :  { %152 = vmin.xlane.f32.xlu0 %v151_v58 }
 0x214   :  { %v153_v23 = vpop.xlane.xlu0 %152 }
 0x215   :  { %v161_v24 = vsub.f32 %v254_v22, %v153_v23 }
 0x217   :  { %v162_v26 = vand.u32 2147483647, %v161_v24 }
 0x219   :  { %vm163_vm5 = vcmp.le.f32.partialorder %v162_v26, 3.0 }
 0x21a   :  { %v255_v30 = vsel %vm163_vm5, 1.0, %v382_v1 }
 0x21b   :  { %v183_v32 = vrot.slane %v255_v30, 1  ;;  %v186_v33 = vmul.f32 %v331_v27, %v255_v30 }
 0x21d   :  { %v187_v35 = vmul.f32 %v335_v29, %v183_v32  ;;  %v206_v36 = vmul.f32 %v333_v28, %v186_v33  ;;  %220 = vst [vmem:[#allocation4] sm:$0x1] %v186_v33 }
 0x21f   :  { %v207_v37 = vmul.f32 %v337_v34, %v187_v35  ;;  %v211_v38 = vrot.slane %v206_v36, %v210_v31  ;;  %221 = vst [vmem:[#allocation4 + $0x1] sm:$0x1] %v187_v35 }
 0x220   :  { %349 = shalt.err (!%p346_p4)
}
 0x221   :  { %s386_s29 = smov 16   ;;  %s387_s0 = smov 1   ;;  %v215_v1 = vrot.slane %v207_v37, %v210_v31  ;;  %v216_v39 = vmul.f32 %v211_v38, %v434_v5 }
 0x222   :  { %245 = dma.vmem_to_hbm [thread:$0]  %s240_s26, 32, %s516_s4, [#allocation5], %s386_s29, %s386_s29, %s387_s0  }
 0x223   :  { %v217_v40 = vmul.f32 %v215_v1, %v439_v6  ;;  %218 = vst [vmem:[#allocation2] sm:$0xf] %v216_v39  ;;  %s358_s6 = scalar_lea.vmem %s228_s27, 128  ;;  %p363_p6 = scmp.lt.s32.totalorder %s228_s27, %s228_s27 }
 0x224   :  { %p359_p5 = scmp.ne.s32.totalorder %s228_s27, %s358_s6  ;;  %p364_p7 = scmp.lt.s32.totalorder %s358_s6, %s358_s6 }
 0x225   :  { %219 = vst [vmem:[#allocation2 + $0x4] sm:$0xf] %v217_v40 }
 0x226   :  { %p365_p8 = por %p364_p7, %p363_p6 }
 0x228   :  { %p366_p9 = pnand %p365_p8, %p359_p5 }
 0x22a   :  { %369 = shalt.err (!%p366_p9)
}
 0x22b   :  { %s388_s7 = smov 64   ;;  %s389_s8 = smov 4  }
 0x22c   :  { %233 = dma.vmem_to_hbm [thread:$0]  %s228_s27, 128, %s515_s3, [#allocation3], %s388_s7, %s388_s7, %s389_s8  }
 0x22d   :  { %378 = dma.done.wait [#allocation3], 128  }
 0x22e   :  { %379 = vsyncadd [#allocation3], 4294967168 }
 0x22f   :  { %380 = dma.done.wait [#allocation5], 32  }
 0x230   :  { %381 = vsyncadd [#allocation5], 4294967264 }
 0x231   :  { %252 = vsyncpa [#allocation3], 1 }
 0x232   :  { %253 = vsyncpa [#allocation5], 1 }

</bundles_post_ra>
